<compile_context>
chip_gen: v5e
topology: v5e:2x2
jax: 0.10.0
libtpu: 0.0.40
codegen_flags: <defaults>
</compile_context>

<pallas_src>
from functools import partial

import jax
import jax.numpy as jnp
from jax.experimental import pallas as pl
from jax.experimental.pallas import tpu as pltpu

_LANE = 128      # lane width (last-dim tiling)
_SUBLANE = 8     # sublane height (second-to-last-dim tiling)


def _round_up(n, m):
    return ((n + m - 1) // m) * m


def _cdiv(a, b):
    return (a + b - 1) // b


# --------------------------------------------------------------------------- #
# Kernel
# --------------------------------------------------------------------------- #
def _head_kernel(x_ref, w1_ref, b1_ref, w2_ref, b2_ref, o_ref, *, activation):
    # hidden = act(x @ W1 + b1): MXU matmul (f32 accumulate), VPU bias, VPU/EUP act.
    h = jnp.dot(x_ref[...], w1_ref[...], preferred_element_type=jnp.float32)
    h = h + b1_ref[...]
    if activation == "relu":
        h = jnp.maximum(h, 0.0)
    else:
        # Tanh approximation -> EUP slot (free relative to the MXU-bound bundle).
        # Note: PyTorch's F.gelu default is the exact erf form; max diff ~1e-3.
        h = jax.nn.gelu(h, approximate=True)

    # logits = hidden @ W2 + b2.  h stays f32 unless the params were prepared in
    # bf16 (compute_dtype), in which case only the matmul operands are bf16 and
    # accumulation is still f32.
    logits = jnp.dot(h.astype(w2_ref.dtype), w2_ref[...],
                     preferred_element_type=jnp.float32)
    logits = logits + b2_ref[...]

    # W2/b2 are lane-padded (multiple of 128) so the compute stays lane-dense;
    # only the real n_classes columns are stored (8x less HBM write at ncls=16).
    n_classes = o_ref.shape[-1]
    if logits.shape[-1] != n_classes:
        logits = logits[:, :n_classes]
    o_ref[...] = logits.astype(o_ref.dtype)


# --------------------------------------------------------------------------- #
# One-time parameter preparation (hoisted out of the per-call path)
# --------------------------------------------------------------------------- #
def prepare_head_params(w1, b1, w2, b2, *, compute_dtype=None):
    """Pad/casts parameters once at load time.

    w1: (in, hidden), w2: (hidden, n_classes) (transpose of nn.Linear.weight);
    biases 1-D or (1, n).  The hidden dim is zero-padded to a multiple of 128
    (zero cols of W1 / zero rows of W2 => identical results); n_classes is
    padded for W2/b2 only.  Weights optionally cast to compute_dtype (bf16 for
    v5e); biases stay f32.
    """
    w1 = jnp.asarray(w1)
    w2 = jnp.asarray(w2)
    in_features, hidden = w1.shape
    hidden2, n_classes = w2.shape
    assert hidden == hidden2, "w1/w2 hidden dims disagree"
    b1 = jnp.asarray(b1).reshape(1, hidden)
    b2 = jnp.asarray(b2).reshape(1, n_classes)

    wdt = jnp.dtype(compute_dtype) if compute_dtype is not None else w1.dtype
    hid_p = _round_up(max(hidden, _LANE), _LANE)
    ncls_p = _round_up(max(n_classes, _LANE), _LANE)

    w1p = jnp.zeros((in_features, hid_p), wdt).at[:, :hidden].set(w1.astype(wdt))
    b1p = jnp.zeros((1, hid_p), jnp.float32).at[:, :hidden].set(b1.astype(jnp.float32))
    w2p = jnp.zeros((hid_p, ncls_p), wdt).at[:hidden, :n_classes].set(w2.astype(wdt))
    b2p = jnp.zeros((1, ncls_p), jnp.float32).at[:, :n_classes].set(b2.astype(jnp.float32))
    return {"w1": w1p, "b1": b1p, "w2": w2p, "b2": b2p,
            "in_features": in_features, "n_classes": n_classes}


# --------------------------------------------------------------------------- #
# Batch tiling
# --------------------------------------------------------------------------- #
def _choose_batch_tile(batch, block_b, tb_cap):
    """Pick (TB, B_pad): step count first, then an 8-row aligned tile.

    Keeps padding small (usually 0, at most ~8*steps rows) instead of up to
    TB-1 rows, and forces >=2 steps when there is enough work so the
    "parallel" batch axis spans both TensorCores on v7x.
    """
    min_steps = max(_cdiv(batch, block_b), 2 if batch >= 2 * _SUBLANE else 1)
    best = None
    for steps in range(min_steps, min_steps + 8):
        tb = min(_round_up(_cdiv(batch, steps), _SUBLANE), tb_cap)
        real_steps = _cdiv(batch, tb)
        pad = real_steps * tb - batch
        cand = (pad, real_steps, tb)
        if best is None or cand < best:
            best = cand
    _, steps, tb = best
    return tb, steps * tb


# --------------------------------------------------------------------------- #
# Forward pass
# --------------------------------------------------------------------------- #
def _classification_head_2d(x, params, *, activation, block_b, vmem_budget_bytes):
    w1, b1, w2, b2 = params["w1"], params["b1"], params["w2"], params["b2"]
    n_classes = params["n_classes"]
    batch, in_features = x.shape
    assert in_features == params["in_features"], "input feature dim mismatch"
    hid_p = w1.shape[1]
    ncls_p = w2.shape[1]
    out_dtype = x.dtype

    x_item = jnp.dtype(x.dtype).itemsize
    w_item = jnp.dtype(w1.dtype).itemsize
    o_item = jnp.dtype(out_dtype).itemsize

    # ---- VMEM budget -> batch-tile cap -------------------------------------
    # Resident weights/biases (counted double-buffered, safe even if the
    # single-buffer request below is unavailable) + per-row cost of the
    # double-buffered x/out tiles and the implicit f32 intermediates
    # (hidden activations and pre-store logits).
    weight_bytes = ((in_features * hid_p + hid_p * ncls_p) * w_item
                    + (hid_p + ncls_p) * 4)
    per_row_bytes = (2 * in_features * x_item     # x, double-buffered
                     + 2 * n_classes * o_item     # out, double-buffered
                     + hid_p * 4                  # hidden activations (f32)
                     + ncls_p * 4)                # f32 logits before store
    free = vmem_budget_bytes - 2 * weight_bytes
    if free > 0:
        tb_cap = max(_SUBLANE, (free // per_row_bytes) // _SUBLANE * _SUBLANE)
    else:
        tb_cap = _SUBLANE

    tb, batch_pad = _choose_batch_tile(batch, block_b, tb_cap)
    steps = batch_pad // tb
    if batch_pad != batch:
        x = jnp.zeros((batch_pad, in_features), x.dtype).at[:batch].set(x)

    # Scoped-VMEM request covering the footprint (v5e default is only 16 MiB);
    # capped at v7x's 64 MiB physical VMEM per TensorCore.
    vmem_limit = int(min(max(2 * weight_bytes + tb * per_row_bytes + (4 << 20),
                             32 << 20),
                         64 << 20))

    flops = 2 * batch_pad * (in_features * hid_p + hid_p * ncls_p)
    transcendentals = 0 if activation == "relu" else batch_pad * hid_p
    bytes_accessed = (batch_pad * in_features * x_item
                      + batch_pad * n_classes * o_item
                      + weight_bytes)

    kernel = partial(_head_kernel, activation=activation)

    def _call(weight_mode):
        wkw = {} if weight_mode is None else {"pipeline_mode": weight_mode}
        in_specs = [
            pl.BlockSpec((tb, in_features), lambda i: (i, 0)),        # x (streamed)
            pl.BlockSpec((in_features, hid_p), lambda i: (0, 0), **wkw),  # W1 resident
            pl.BlockSpec((1, hid_p), lambda i: (0, 0), **wkw),            # b1 resident
            pl.BlockSpec((hid_p, ncls_p), lambda i: (0, 0), **wkw),       # W2 resident
            pl.BlockSpec((1, ncls_p), lambda i: (0, 0), **wkw),           # b2 resident
        ]
        return pl.pallas_call(
            kernel,
            out_shape=jax.ShapeDtypeStruct((batch_pad, n_classes), out_dtype),
            grid=(steps,),
            in_specs=in_specs,
            out_specs=pl.BlockSpec((tb, n_classes), lambda i: (i, 0)),
            compiler_params=pltpu.CompilerParams(
                dimension_semantics=("parallel",),
                vmem_limit_bytes=vmem_limit,
            ),
            cost_estimate=pl.CostEstimate(
                flops=flops,
                transcendentals=transcendentals,
                bytes_accessed=bytes_accessed,
            ),
        )(x, w1, b1, w2, b2)

    try:
        # Grid-invariant operands single-buffered: halves weight VMEM residency
        # (matters most on v7x's 64 MiB VMEM with large weight matrices).
        out = _call(pl.Buffered(1))
    except Exception:  # Pallas build without single-buffer support: default pipeline.
        out = _call(None)

    return out if batch_pad == batch else out[:batch]


def make_classification_head(w1, b1, w2, b2, *, activation="relu",
                             compute_dtype=None, block_b=1024,
                             vmem_budget_bytes=40 << 20):
    """Build `apply(x)` equivalent to ClassificationHead.forward.

    Parameter padding/casting happens once here (not per call).  Set
    compute_dtype=jnp.bfloat16 on v5e (f32 MXU matmul is emulated there).
    """
    if activation not in ("relu", "gelu"):
        raise ValueError("activation must be 'relu' or 'gelu'")
    params = prepare_head_params(w1, b1, w2, b2, compute_dtype=compute_dtype)

    def apply(x):
        lead = x.shape[:-1]
        out = _classification_head_2d(
            x.reshape(-1, x.shape[-1]), params,
            activation=activation, block_b=block_b,
            vmem_budget_bytes=vmem_budget_bytes)
        return out.reshape(*lead, params["n_classes"])

    return apply


# --------------------------------------------------------------------------- #
# Pure-JAX reference and demo
# --------------------------------------------------------------------------- #
def _reference(x, w1, b1, w2, b2, activation="relu"):
    h = x @ w1 + jnp.asarray(b1).reshape(1, -1)
    h = jnp.maximum(h, 0.0) if activation == "relu" else jax.nn.gelu(h, approximate=True)
    return h @ w2 + jnp.asarray(b2).reshape(1, -1)


if __name__ == "__main__":
    # Shapes consistent with the module: in_features=32, hidden=64, n_classes=16.
    B, IN, HID, NCLS = 8, 32, 64, 16

    key = jax.random.PRNGKey(0)
    kx, kw1, kw2, kx2 = jax.random.split(key, 4)

    x = jax.random.normal(kx, (B, IN), dtype=jnp.float32)

    # Deterministic xavier-uniform-style init; biases zero (bias=True, 'zeros').
    lim1 = (6.0 / (IN + HID)) ** 0.5
    lim2 = (6.0 / (HID + NCLS)) ** 0.5
    w1 = jax.random.uniform(kw1, (IN, HID), jnp.float32, -lim1, lim1)
    b1 = jnp.zeros((HID,), jnp.float32)
    w2 = jax.random.uniform(kw2, (HID, NCLS), jnp.float32, -lim2, lim2)
    b2 = jnp.zeros((NCLS,), jnp.float32)

    # 1) Tiny batch, ReLU path (single grid step).
    head_relu = make_classification_head(w1, b1, w2, b2, activation="relu")
    out = jax.block_until_ready(head_relu(x))
    ref = _reference(x, w1, b1, w2, b2, "relu")
    assert out.shape == (B, NCLS)
    assert jnp.allclose(out, ref, atol=1e-5, rtol=1e-5), \
        float(jnp.max(jnp.abs(out - ref)))

    # 2) Larger, non-power-of-two batch with a small block: multi-step pipelined
    #    grid (zero batch padding with the new tiling) + GELU path.
    B2 = 200
    x2 = jax.random.normal(kx2, (B2, IN), dtype=jnp.float32)
    head_gelu = make_classification_head(w1, b1, w2, b2, activation="gelu", block_b=64)
    out2 = jax.block_until_ready(head_gelu(x2))
    ref2 = _reference(x2, w1, b1, w2, b2, "gelu")
    assert out2.shape == (B2, NCLS)
    assert jnp.allclose(out2, ref2, atol=1e-4, rtol=1e-4), \
        float(jnp.max(jnp.abs(out2 - ref2)))

    print("KERNEL_OK")
</pallas_src>

<mosaic_0001>
module attributes {stable_mosaic.version = 11 : i64} {
  func.func @_head_kernel(%arg0: i32, %arg1: memref<8x32xf32, #tpu.memory_space<vmem>>, %arg2: memref<32x128xf32, #tpu.memory_space<vmem>>, %arg3: memref<1x128xf32, #tpu.memory_space<vmem>>, %arg4: memref<128x128xf32, #tpu.memory_space<vmem>>, %arg5: memref<1x128xf32, #tpu.memory_space<vmem>>, %arg6: memref<8x16xf32, #tpu.memory_space<vmem>>) attributes {dimension_semantics = [#tpu.dimension_semantics<parallel>], iteration_bounds = array<i64: 1>, scalar_prefetch = 0 : i64, scratch_operands = 0 : i64, tpu.core_type = #tpu.core_type<tc>, window_params = [{transform_indices = @transform_0, window_bounds = array<i64: 8, 32>}, {pipeline_mode = #tpu.pipeline_mode<synchronous>, transform_indices = @transform_1, window_bounds = array<i64: 32, 128>}, {pipeline_mode = #tpu.pipeline_mode<synchronous>, transform_indices = @transform_2, window_bounds = array<i64: 1, 128>}, {pipeline_mode = #tpu.pipeline_mode<synchronous>, transform_indices = @transform_3, window_bounds = array<i64: 128, 128>}, {pipeline_mode = #tpu.pipeline_mode<synchronous>, transform_indices = @transform_4, window_bounds = array<i64: 1, 128>}, {transform_indices = @transform_5, window_bounds = array<i64: 8, 16>}]} {
    %c0 = arith.constant 0 : index
    %c0_0 = arith.constant 0 : index
    %0 = vector.load %arg1[%c0, %c0_0] : memref<8x32xf32, #tpu.memory_space<vmem>>, vector<8x32xf32>
    %c0_1 = arith.constant 0 : index
    %c0_2 = arith.constant 0 : index
    %1 = vector.load %arg2[%c0_1, %c0_2] : memref<32x128xf32, #tpu.memory_space<vmem>>, vector<32x128xf32>
    %cst = arith.constant dense<0.000000e+00> : vector<8x128xf32>
    %2 = tpu.matmul %0, %1, %cst {dimension_numbers = #tpu.dot_dimension_numbers<[1], [0], [0], [1], [0, 0, 1, 1], [], []>} : vector<8x32xf32>, vector<32x128xf32>, vector<8x128xf32> -> vector<8x128xf32>
    %c0_3 = arith.constant 0 : index
    %c0_4 = arith.constant 0 : index
    %3 = vector.load %arg3[%c0_3, %c0_4] : memref<1x128xf32, #tpu.memory_space<vmem>>, vector<1x128xf32>
    %4 = vector.broadcast %3 : vector<1x128xf32> to vector<8x128xf32>
    %5 = arith.addf %2, %4 : vector<8x128xf32>
    %cst_5 = arith.constant 0.000000e+00 : f32
    %6 = vector.broadcast %cst_5 : f32 to vector<8x128xf32>
    %7 = arith.maximumf %5, %6 : vector<8x128xf32>
    %c0_6 = arith.constant 0 : index
    %c0_7 = arith.constant 0 : index
    %8 = vector.load %arg4[%c0_6, %c0_7] : memref<128x128xf32, #tpu.memory_space<vmem>>, vector<128x128xf32>
    %cst_8 = arith.constant dense<0.000000e+00> : vector<8x128xf32>
    %9 = tpu.matmul %7, %8, %cst_8 {dimension_numbers = #tpu.dot_dimension_numbers<[1], [0], [0], [1], [0, 0, 1, 1], [], []>} : vector<8x128xf32>, vector<128x128xf32>, vector<8x128xf32> -> vector<8x128xf32>
    %c0_9 = arith.constant 0 : index
    %c0_10 = arith.constant 0 : index
    %10 = vector.load %arg5[%c0_9, %c0_10] : memref<1x128xf32, #tpu.memory_space<vmem>>, vector<1x128xf32>
    %11 = vector.broadcast %10 : vector<1x128xf32> to vector<8x128xf32>
    %12 = arith.addf %9, %11 : vector<8x128xf32>
    %13 = vector.extract_strided_slice %12 {offsets = [0, 0], sizes = [8, 16], strides = [1, 1]} : vector<8x128xf32> to vector<8x16xf32>
    %c0_11 = arith.constant 0 : index
    %c0_12 = arith.constant 0 : index
    %14 = vector.load %arg6[%c0_11, %c0_12] : memref<8x16xf32, #tpu.memory_space<vmem>>, vector<8x16xf32>
    tpu.vector_store %arg6[%c0_11, %c0_12], %13 {strides = array<i32>} : memref<8x16xf32, #tpu.memory_space<vmem>>, vector<8x16xf32>,
    return
  }
  func.func @transform_0(%arg0: i32) -> (i32, i32) {
    %c0_i32 = arith.constant 0 : i32
    %c0_i32_0 = arith.constant 0 : i32
    return %arg0, %c0_i32 : i32, i32
  }
  func.func @transform_1(%arg0: i32) -> (i32, i32) {
    %c0_i32 = arith.constant 0 : i32
    %c0_i32_0 = arith.constant 0 : i32
    %c0_i32_1 = arith.constant 0 : i32
    return %c0_i32, %c0_i32_0 : i32, i32
  }
  func.func @transform_2(%arg0: i32) -> (i32, i32) {
    %c0_i32 = arith.constant 0 : i32
    %c0_i32_0 = arith.constant 0 : i32
    %c0_i32_1 = arith.constant 0 : i32
    return %c0_i32, %c0_i32_0 : i32, i32
  }
  func.func @transform_3(%arg0: i32) -> (i32, i32) {
    %c0_i32 = arith.constant 0 : i32
    %c0_i32_0 = arith.constant 0 : i32
    %c0_i32_1 = arith.constant 0 : i32
    return %c0_i32, %c0_i32_0 : i32, i32
  }
  func.func @transform_4(%arg0: i32) -> (i32, i32) {
    %c0_i32 = arith.constant 0 : i32
    %c0_i32_0 = arith.constant 0 : i32
    %c0_i32_1 = arith.constant 0 : i32
    return %c0_i32, %c0_i32_0 : i32, i32
  }
  func.func @transform_5(%arg0: i32) -> (i32, i32) {
    %c0_i32 = arith.constant 0 : i32
    %c0_i32_0 = arith.constant 0 : i32
    return %arg0, %c0_i32 : i32, i32
  }
}

module attributes {stable_mosaic.version = 11 : i64} {
  func.func @_head_kernel(%arg0: i32, %arg1: memref<8x32xf32, #tpu.memory_space<vmem>>, %arg2: memref<32x128xf32, #tpu.memory_space<vmem>>, %arg3: memref<1x128xf32, #tpu.memory_space<vmem>>, %arg4: memref<128x128xf32, #tpu.memory_space<vmem>>, %arg5: memref<1x128xf32, #tpu.memory_space<vmem>>, %arg6: memref<8x16xf32, #tpu.memory_space<vmem>>) attributes {dimension_semantics = [#tpu.dimension_semantics<parallel>], iteration_bounds = array<i64: 1>, scalar_prefetch = 0 : i64, scratch_operands = 0 : i64, tpu.core_type = #tpu.core_type<tc>, window_params = [{transform_indices = @transform_0, window_bounds = array<i64: 8, 32>}, {pipeline_mode = #tpu.pipeline_mode<synchronous>, transform_indices = @transform_1, window_bounds = array<i64: 32, 128>}, {pipeline_mode = #tpu.pipeline_mode<synchronous>, transform_indices = @transform_2, window_bounds = array<i64: 1, 128>}, {pipeline_mode = #tpu.pipeline_mode<synchronous>, transform_indices = @transform_3, window_bounds = array<i64: 128, 128>}, {pipeline_mode = #tpu.pipeline_mode<synchronous>, transform_indices = @transform_4, window_bounds = array<i64: 1, 128>}, {transform_indices = @transform_5, window_bounds = array<i64: 8, 16>}]} {
    %c0 = arith.constant 0 : index
    %c0_0 = arith.constant 0 : index
    %0 = vector.load %arg1[%c0, %c0_0] : memref<8x32xf32, #tpu.memory_space<vmem>>, vector<8x32xf32>
    %c0_1 = arith.constant 0 : index
    %c0_2 = arith.constant 0 : index
    %1 = vector.load %arg2[%c0_1, %c0_2] : memref<32x128xf32, #tpu.memory_space<vmem>>, vector<32x128xf32>
    %cst = arith.constant dense<0.000000e+00> : vector<8x128xf32>
    %2 = tpu.matmul %0, %1, %cst {dimension_numbers = #tpu.dot_dimension_numbers<[1], [0], [0], [1], [0, 0, 1, 1], [], []>} : vector<8x32xf32>, vector<32x128xf32>, vector<8x128xf32> -> vector<8x128xf32>
    %c0_3 = arith.constant 0 : index
    %c0_4 = arith.constant 0 : index
    %3 = vector.load %arg3[%c0_3, %c0_4] : memref<1x128xf32, #tpu.memory_space<vmem>>, vector<1x128xf32>
    %4 = vector.broadcast %3 : vector<1x128xf32> to vector<8x128xf32>
    %5 = arith.addf %2, %4 : vector<8x128xf32>
    %cst_5 = arith.constant 0.000000e+00 : f32
    %6 = vector.broadcast %cst_5 : f32 to vector<8x128xf32>
    %7 = arith.maximumf %5, %6 : vector<8x128xf32>
    %c0_6 = arith.constant 0 : index
    %c0_7 = arith.constant 0 : index
    %8 = vector.load %arg4[%c0_6, %c0_7] : memref<128x128xf32, #tpu.memory_space<vmem>>, vector<128x128xf32>
    %cst_8 = arith.constant dense<0.000000e+00> : vector<8x128xf32>
    %9 = tpu.matmul %7, %8, %cst_8 {dimension_numbers = #tpu.dot_dimension_numbers<[1], [0], [0], [1], [0, 0, 1, 1], [], []>} : vector<8x128xf32>, vector<128x128xf32>, vector<8x128xf32> -> vector<8x128xf32>
    %c0_9 = arith.constant 0 : index
    %c0_10 = arith.constant 0 : index
    %10 = vector.load %arg5[%c0_9, %c0_10] : memref<1x128xf32, #tpu.memory_space<vmem>>, vector<1x128xf32>
    %11 = vector.broadcast %10 : vector<1x128xf32> to vector<8x128xf32>
    %12 = arith.addf %9, %11 : vector<8x128xf32>
    %13 = vector.extract_strided_slice %12 {offsets = [0, 0], sizes = [8, 16], strides = [1, 1]} : vector<8x128xf32> to vector<8x16xf32>
    %c0_11 = arith.constant 0 : index
    %c0_12 = arith.constant 0 : index
    %14 = vector.load %arg6[%c0_11, %c0_12] : memref<8x16xf32, #tpu.memory_space<vmem>>, vector<8x16xf32>
    tpu.vector_store %arg6[%c0_11, %c0_12], %13 {strides = array<i32>} : memref<8x16xf32, #tpu.memory_space<vmem>>, vector<8x16xf32>,
    return
  }
  func.func @transform_0(%arg0: i32) -> (i32, i32) {
    %c0_i32 = arith.constant 0 : i32
    %c0_i32_0 = arith.constant 0 : i32
    return %arg0, %c0_i32 : i32, i32
  }
  func.func @transform_1(%arg0: i32) -> (i32, i32) {
    %c0_i32 = arith.constant 0 : i32
    %c0_i32_0 = arith.constant 0 : i32
    %c0_i32_1 = arith.constant 0 : i32
    return %c0_i32, %c0_i32_0 : i32, i32
  }
  func.func @transform_2(%arg0: i32) -> (i32, i32) {
    %c0_i32 = arith.constant 0 : i32
    %c0_i32_0 = arith.constant 0 : i32
    %c0_i32_1 = arith.constant 0 : i32
    return %c0_i32, %c0_i32_0 : i32, i32
  }
  func.func @transform_3(%arg0: i32) -> (i32, i32) {
    %c0_i32 = arith.constant 0 : i32
    %c0_i32_0 = arith.constant 0 : i32
    %c0_i32_1 = arith.constant 0 : i32
    return %c0_i32, %c0_i32_0 : i32, i32
  }
  func.func @transform_4(%arg0: i32) -> (i32, i32) {
    %c0_i32 = arith.constant 0 : i32
    %c0_i32_0 = arith.constant 0 : i32
    %c0_i32_1 = arith.constant 0 : i32
    return %c0_i32, %c0_i32_0 : i32, i32
  }
  func.func @transform_5(%arg0: i32) -> (i32, i32) {
    %c0_i32 = arith.constant 0 : i32
    %c0_i32_0 = arith.constant 0 : i32
    return %arg0, %c0_i32 : i32, i32
  }
}

</mosaic_0001>

<bundles_post_ra>
// kernel: tpu_custom_call.1
= control target key start
LH: loop header
LB: loop body
LE: loop exit
PB: predicated region body
PF: predicated region fallthrough
CT: control target
= control target key end

     0   :  { %10 = vsyncpa [#allocation3], 0  ;;  %s325_s0 = inlined_call_operand.hbm [shape: f32[8,32], index: 0, kind: input, shape index: {}]   ;;  %s326_s1 = inlined_call_operand.hbm [shape: f32[32,128], index: 1, kind: input, shape index: {}]   ;;  %s327_s2 = inlined_call_operand.vmem [shape: f32[1,128], index: 2, kind: input, shape index: {}]   ;;  %s328_s3 = inlined_call_operand.hbm [shape: f32[128,128], index: 3, kind: input, shape index: {}]   ;;  %s329_s4 = inlined_call_operand.vmem [shape: f32[1,128], index: 4, kind: input, shape index: {}]   ;;  %s330_s5 = inlined_call_operand.hbm [shape: f32[8,16], index: 5, kind: output, shape index: {}]  }
   0x1   :  { %11 = vsyncpa [#allocation6], 0  ;;  %s28_s20 = sshll.u32 %s326_s1, 4  ;;  %s29_s20 = int_to_ptr.hbm [resolvable:$true] %s28_s20 }
   0x2   :  { %12 = vsyncpa [#allocation4], 0  ;;  %s271_s21 = smov [#allocation5]   ;;  %s18_s25 = sshll.u32 %s325_s0, 4  ;;  %s19_s25 = int_to_ptr.hbm [resolvable:$true] %s18_s25 }
   0x3   :  { %s30_s22 = sshll.u32 %s271_s21, 4  ;;  %s272_s26 = smov 128   ;;  %s31_s22 = int_to_ptr.vmem [resolvable:$true] %s30_s22 }
   0x4   :  { %s273_s27 = smov 8   ;;  %s274_s28 = smov [#allocation2]  }
   0x5   :  { %36 = dma.hbm_to_vmem [thread:$0]  %s29_s20, 512, %s31_s22, [#allocation6], %s272_s26, %s272_s26, %s273_s27  }
   0x6   :  { %s20_s29 = sshll.u32 %s274_s28, 4  ;;  %s43_s7 = sshll.u32 %s328_s3, 4  ;;  %s21_s29 = int_to_ptr.vmem [resolvable:$true] %s20_s29  ;;  %s44_s7 = int_to_ptr.hbm [resolvable:$true] %s43_s7 }
   0x7   :  { %23 = dma.hbm_to_vmem [thread:$0]  %s19_s25, 128, %s21_s29, [#allocation3]  }
   0x8   :  { %s275_s1 = smov [#allocation7]  }
   0x9   :  { %s45_s8 = sshll.u32 %s275_s1, 4  ;;  %s46_s8 = int_to_ptr.vmem [resolvable:$true] %s45_s8 }
   0xa   :  { %51 = dma.hbm_to_vmem [thread:$0]  %s44_s7, 2048, %s46_s8, [#allocation6], %s272_s26, %s272_s26, %s273_s27  }
   0xb   :  { %265 = dma.done.wait [#allocation3], 128  }
   0xc   :  { %266 = vsyncadd [#allocation3], 4294967168 }
   0xd   :  { %267 = dma.done.wait [#allocation6], 2560  }
   0xe   :  { %268 = vsyncadd [#allocation6], 4294964736  ;;  %v70_v0 = vld [vmem:[#allocation5 + $0x18] sm:$0xff]  ;;  %v69_v1 = vld [vmem:[#allocation5 + $0x10] sm:$0xff]  ;;  %vm75_vm0 = vcmask 261120   ;;  %s276_s11 = smov [#allocation8]  }
   0xf   :  { %91 = vmatpush.msra.mxu0 %v70_v0  ;;  %v115_v2 = vld [vmem:[#allocation7 + $0x78] sm:$0xff]  ;;  %v68_v3 = vld [vmem:[#allocation5 + $0x8] sm:$0xff]  ;;  %v114_v4 = vld [vmem:[#allocation7 + $0x70] sm:$0xff]  ;;  %s147_s12 = sshll.u32 %s276_s11, 4  ;;  %s149_s15 = sshll.u32 %s330_s5, 4  ;;  %vm140_vm1 = vcmask 130048   ;;  %s148_s12 = int_to_ptr.vmem [resolvable:$true] %s147_s12  ;;  %s150_s15 = int_to_ptr.hbm [resolvable:$true] %s149_s15 }
  0x10   :  { %120 = vmatpush.msra.mxu1 %v115_v2  ;;  %v113_v5 = vld [vmem:[#allocation7 + $0x68] sm:$0xff]  ;;  %v67_v6 = vld [vmem:[#allocation5] sm:$0xff]  ;;  %v66_v7 = vld [vmem:[#allocation2] sm:$0xff] }
  0x11   :  { %92 = vmatpush.msra.mxu0 %v69_v1  ;;  %v112_v8 = vld [vmem:[#allocation7 + $0x60] sm:$0xff]  ;;  %v111_v9 = vld [vmem:[#allocation7 + $0x58] sm:$0xff]  ;;  %v110_v10 = vld [vmem:[#allocation7 + $0x50] sm:$0xff] }
  0x12   :  { %121 = vmatpush.msra.mxu1 %v114_v4  ;;  %v109_v11 = vld [vmem:[#allocation7 + $0x48] sm:$0xff]  ;;  %v108_v12 = vld [vmem:[#allocation7 + $0x40] sm:$0xff]  ;;  %v107_v13 = vld [vmem:[#allocation7 + $0x38] sm:$0xff] }
  0x13   :  { %93 = vmatpush.msra.mxu0 %v68_v3  ;;  %v106_v14 = vld [vmem:[#allocation7 + $0x30] sm:$0xff]  ;;  %v105_v15 = vld [vmem:[#allocation7 + $0x28] sm:$0xff]  ;;  %v104_v16 = vld [vmem:[#allocation7 + $0x20] sm:$0xff] }
  0x14   :  { %122 = vmatpush.msra.mxu1 %v113_v5  ;;  %v103_v17 = vld [vmem:[#allocation7 + $0x18] sm:$0xff]  ;;  %v102_v18 = vld [vmem:[#allocation7 + $0x10] sm:$0xff]  ;;  %v101_v19 = vld [vmem:[#allocation7 + $0x8] sm:$0xff] }
  0x15   :  { %94 = vmatpush.msra.mxu0 %v67_v6  ;;  %v100_v20 = vld [vmem:[#allocation7] sm:$0xff]  ;;  %v167_v21 = vld [vmem:[%s327_s2] ss:$0 sm:$0xff] }
  0x16   :  { %160 = vmatmul.msk.f32.vlgmr.msra.gmra.mxu0 %vm75_vm0, %v66_v7  ;;  %123 = vmatpush.msra.mxu1 %v112_v8  ;;  %v168_v25 = vld [vmem:[%s329_s4] ss:$0 sm:$0xff] }
  0x18   :  { %124 = vmatpush.msra.mxu1 %v111_v9 }
  0x1a   :  { %125 = vmatpush.msra.mxu1 %v110_v10 }
  0x1c   :  { %126 = vmatpush.msra.mxu1 %v109_v11 }
  0x1e   :  { %127 = vmatpush.msra.mxu1 %v108_v12 }
  0x20   :  { %128 = vmatpush.msra.mxu1 %v107_v13 }
  0x22   :  { %129 = vmatpush.msra.mxu1 %v106_v14 }
  0x24   :  { %130 = vmatpush.msra.mxu1 %v105_v15 }
  0x26   :  { %131 = vmatpush.msra.mxu1 %v104_v16 }
  0x28   :  { %132 = vmatpush.msra.mxu1 %v103_v17 }
  0x2a   :  { %133 = vmatpush.msra.mxu1 %v102_v18 }
  0x2c   :  { %134 = vmatpush.msra.mxu1 %v101_v19 }
  0x2e   :  { %135 = vmatpush.msra.mxu1 %v100_v20 }
  0x93   :  { %v96_v22 = vpop.f32.mrf.mxu0 }
  0x94   :  { %v97_v23 = vadd.f32 %v167_v21, %v96_v22 }
  0x96   :  { %v99_v24 = vmax.f32 %v97_v23, 0.0 }
  0x98   :  { %136 = vmatmul.f32.vlgmr.msra.gmra.mxu1 %v99_v24 }
 0x115   :  { %v137_v26 = vpop.f32.mrf.mxu1 }
 0x116   :  { %v138_v27 = vadd.f32 %v168_v25, %v137_v26 }
 0x118   :  { %141 = vst.msk [vmem:[#allocation8] sm:$0xff] %vm140_vm1, %v138_v27 }
 0x119   :  { %152 = dma.vmem_to_hbm [thread:$0]  %s148_s12, 128, %s150_s15, [#allocation4]  }
 0x11a   :  { %269 = dma.done.wait [#allocation4], 128  }
 0x11b   :  { %270 = vsyncadd [#allocation4], 4294967168 }
 0x11c   :  { %157 = vsyncpa [#allocation3], 1 }
 0x11d   :  { %158 = vsyncpa [#allocation6], 1 }
 0x11e   :  { %159 = vsyncpa [#allocation4], 1 }

// kernel: tpu_custom_call.1
= control target key start
LH: loop header
LB: loop body
LE: loop exit
PB: predicated region body
PF: predicated region fallthrough
CT: control target
= control target key end

     0   :  { %10 = vsyncpa [#allocation3], 0  ;;  %s325_s0 = inlined_call_operand.hbm [shape: f32[8,32], index: 0, kind: input, shape index: {}]   ;;  %s326_s1 = inlined_call_operand.hbm [shape: f32[32,128], index: 1, kind: input, shape index: {}]   ;;  %s327_s2 = inlined_call_operand.vmem [shape: f32[1,128], index: 2, kind: input, shape index: {}]   ;;  %s328_s3 = inlined_call_operand.hbm [shape: f32[128,128], index: 3, kind: input, shape index: {}]   ;;  %s329_s4 = inlined_call_operand.vmem [shape: f32[1,128], index: 4, kind: input, shape index: {}]   ;;  %s330_s5 = inlined_call_operand.hbm [shape: f32[8,16], index: 5, kind: output, shape index: {}]  }
   0x1   :  { %11 = vsyncpa [#allocation6], 0  ;;  %s28_s20 = sshll.u32 %s326_s1, 4  ;;  %s29_s20 = int_to_ptr.hbm [resolvable:$true] %s28_s20 }
   0x2   :  { %12 = vsyncpa [#allocation4], 0  ;;  %s271_s21 = smov [#allocation5]   ;;  %s18_s25 = sshll.u32 %s325_s0, 4  ;;  %s19_s25 = int_to_ptr.hbm [resolvable:$true] %s18_s25 }
   0x3   :  { %s30_s22 = sshll.u32 %s271_s21, 4  ;;  %s272_s26 = smov 128   ;;  %s31_s22 = int_to_ptr.vmem [resolvable:$true] %s30_s22 }
   0x4   :  { %s273_s27 = smov 8   ;;  %s274_s28 = smov [#allocation2]  }
   0x5   :  { %36 = dma.hbm_to_vmem [thread:$0]  %s29_s20, 512, %s31_s22, [#allocation6], %s272_s26, %s272_s26, %s273_s27  }
   0x6   :  { %s20_s29 = sshll.u32 %s274_s28, 4  ;;  %s43_s7 = sshll.u32 %s328_s3, 4  ;;  %s21_s29 = int_to_ptr.vmem [resolvable:$true] %s20_s29  ;;  %s44_s7 = int_to_ptr.hbm [resolvable:$true] %s43_s7 }
   0x7   :  { %23 = dma.hbm_to_vmem [thread:$0]  %s19_s25, 128, %s21_s29, [#allocation3]  }
   0x8   :  { %s275_s1 = smov [#allocation7]  }
   0x9   :  { %s45_s8 = sshll.u32 %s275_s1, 4  ;;  %s46_s8 = int_to_ptr.vmem [resolvable:$true] %s45_s8 }
   0xa   :  { %51 = dma.hbm_to_vmem [thread:$0]  %s44_s7, 2048, %s46_s8, [#allocation6], %s272_s26, %s272_s26, %s273_s27  }
   0xb   :  { %265 = dma.done.wait [#allocation3], 128  }
   0xc   :  { %266 = vsyncadd [#allocation3], 4294967168 }
   0xd   :  { %267 = dma.done.wait [#allocation6], 2560  }
   0xe   :  { %268 = vsyncadd [#allocation6], 4294964736  ;;  %v70_v0 = vld [vmem:[#allocation5 + $0x18] sm:$0xff]  ;;  %v69_v1 = vld [vmem:[#allocation5 + $0x10] sm:$0xff]  ;;  %vm75_vm0 = vcmask 261120   ;;  %s276_s11 = smov [#allocation8]  }
   0xf   :  { %91 = vmatpush.msra.mxu0 %v70_v0  ;;  %v115_v2 = vld [vmem:[#allocation7 + $0x78] sm:$0xff]  ;;  %v68_v3 = vld [vmem:[#allocation5 + $0x8] sm:$0xff]  ;;  %v114_v4 = vld [vmem:[#allocation7 + $0x70] sm:$0xff]  ;;  %s147_s12 = sshll.u32 %s276_s11, 4  ;;  %s149_s15 = sshll.u32 %s330_s5, 4  ;;  %vm140_vm1 = vcmask 130048   ;;  %s148_s12 = int_to_ptr.vmem [resolvable:$true] %s147_s12  ;;  %s150_s15 = int_to_ptr.hbm [resolvable:$true] %s149_s15 }
  0x10   :  { %120 = vmatpush.msra.mxu1 %v115_v2  ;;  %v113_v5 = vld [vmem:[#allocation7 + $0x68] sm:$0xff]  ;;  %v67_v6 = vld [vmem:[#allocation5] sm:$0xff]  ;;  %v66_v7 = vld [vmem:[#allocation2] sm:$0xff] }
  0x11   :  { %92 = vmatpush.msra.mxu0 %v69_v1  ;;  %v112_v8 = vld [vmem:[#allocation7 + $0x60] sm:$0xff]  ;;  %v111_v9 = vld [vmem:[#allocation7 + $0x58] sm:$0xff]  ;;  %v110_v10 = vld [vmem:[#allocation7 + $0x50] sm:$0xff] }
  0x12   :  { %121 = vmatpush.msra.mxu1 %v114_v4  ;;  %v109_v11 = vld [vmem:[#allocation7 + $0x48] sm:$0xff]  ;;  %v108_v12 = vld [vmem:[#allocation7 + $0x40] sm:$0xff]  ;;  %v107_v13 = vld [vmem:[#allocation7 + $0x38] sm:$0xff] }
  0x13   :  { %93 = vmatpush.msra.mxu0 %v68_v3  ;;  %v106_v14 = vld [vmem:[#allocation7 + $0x30] sm:$0xff]  ;;  %v105_v15 = vld [vmem:[#allocation7 + $0x28] sm:$0xff]  ;;  %v104_v16 = vld [vmem:[#allocation7 + $0x20] sm:$0xff] }
  0x14   :  { %122 = vmatpush.msra.mxu1 %v113_v5  ;;  %v103_v17 = vld [vmem:[#allocation7 + $0x18] sm:$0xff]  ;;  %v102_v18 = vld [vmem:[#allocation7 + $0x10] sm:$0xff]  ;;  %v101_v19 = vld [vmem:[#allocation7 + $0x8] sm:$0xff] }
  0x15   :  { %94 = vmatpush.msra.mxu0 %v67_v6  ;;  %v100_v20 = vld [vmem:[#allocation7] sm:$0xff]  ;;  %v167_v21 = vld [vmem:[%s327_s2] ss:$0 sm:$0xff] }
  0x16   :  { %160 = vmatmul.msk.f32.vlgmr.msra.gmra.mxu0 %vm75_vm0, %v66_v7  ;;  %123 = vmatpush.msra.mxu1 %v112_v8  ;;  %v168_v25 = vld [vmem:[%s329_s4] ss:$0 sm:$0xff] }
  0x18   :  { %124 = vmatpush.msra.mxu1 %v111_v9 }
  0x1a   :  { %125 = vmatpush.msra.mxu1 %v110_v10 }
  0x1c   :  { %126 = vmatpush.msra.mxu1 %v109_v11 }
  0x1e   :  { %127 = vmatpush.msra.mxu1 %v108_v12 }
  0x20   :  { %128 = vmatpush.msra.mxu1 %v107_v13 }
  0x22   :  { %129 = vmatpush.msra.mxu1 %v106_v14 }
  0x24   :  { %130 = vmatpush.msra.mxu1 %v105_v15 }
  0x26   :  { %131 = vmatpush.msra.mxu1 %v104_v16 }
  0x28   :  { %132 = vmatpush.msra.mxu1 %v103_v17 }
  0x2a   :  { %133 = vmatpush.msra.mxu1 %v102_v18 }
  0x2c   :  { %134 = vmatpush.msra.mxu1 %v101_v19 }
  0x2e   :  { %135 = vmatpush.msra.mxu1 %v100_v20 }
  0x93   :  { %v96_v22 = vpop.f32.mrf.mxu0 }
  0x94   :  { %v97_v23 = vadd.f32 %v167_v21, %v96_v22 }
  0x96   :  { %v99_v24 = vmax.f32 %v97_v23, 0.0 }
  0x98   :  { %136 = vmatmul.f32.vlgmr.msra.gmra.mxu1 %v99_v24 }
 0x115   :  { %v137_v26 = vpop.f32.mrf.mxu1 }
 0x116   :  { %v138_v27 = vadd.f32 %v168_v25, %v137_v26 }
 0x118   :  { %141 = vst.msk [vmem:[#allocation8] sm:$0xff] %vm140_vm1, %v138_v27 }
 0x119   :  { %152 = dma.vmem_to_hbm [thread:$0]  %s148_s12, 128, %s150_s15, [#allocation4]  }
 0x11a   :  { %269 = dma.done.wait [#allocation4], 128  }
 0x11b   :  { %270 = vsyncadd [#allocation4], 4294967168 }
 0x11c   :  { %157 = vsyncpa [#allocation3], 1 }
 0x11d   :  { %158 = vsyncpa [#allocation6], 1 }
 0x11e   :  { %159 = vsyncpa [#allocation4], 1 }

</bundles_post_ra>
